<compile_context>
chip_gen: v7x
topology: tpu7x:2x2x1
jax: 0.10.0
libtpu: 0.0.40
codegen_flags: <defaults>
</compile_context>

<pallas_src>
import functools
import math

import jax
import jax.numpy as jnp
from jax.experimental import pallas as pl
from jax.experimental.pallas import tpu as pltpu


def _label_smoothing_kl_kernel(logp_ref, tgt_ref, sel_ref, psum_ref, *,
                               smoothing_value, t_coef, s_log_s, const_term,
                               ignore_index, ignore_col,
                               tiles_per_slice, batch):
    c = pl.program_id(0)          # slice (megacore-parallel axis)
    j = pl.program_id(1)          # row-tile within slice (reduction axis)

    @pl.when(j == 0)
    def _():
        psum_ref[...] = jnp.zeros_like(psum_ref)

    logp = logp_ref[...]                               # (tile_b, V), native dtype
    tgt = tgt_ref[...]                                 # (tile_b, 1) int32
    tile_b, v = logp.shape

    # Bulk row sum S and the ignore-column pick, both off the VPU: a single MXU
    # dot against [ones | onehot(ignore_col) | 0...] with f32 accumulation.
    r = jnp.dot(logp, sel_ref[...], preferred_element_type=jnp.float32)   # (tile_b, 128)
    s_row = r[:, 0:1]                                  # sum_j logp[i, j]
    ign_val = r[:, 1:2]                                # logp[i, ignore_col]

    # Target-column pick: the only remaining per-element VPU work.
    col = jax.lax.broadcasted_iota(jnp.int32, (tile_b, v), 1)
    picked = jnp.where(col == tgt, logp, jnp.zeros_like(logp))
    t_val = jnp.sum(picked, axis=-1, keepdims=True, dtype=jnp.float32)    # (tile_b, 1)

    # Row validity: PyTorch masked_fill(target == ignore_index) plus padded /
    # duplicated tail rows (unclamped global row index vs. true batch size).
    # Applied at row granularity only (no (tile_b, V) masks).
    tile_idx = c * tiles_per_slice + j
    grow = jax.lax.broadcasted_iota(jnp.int32, (tile_b, 1), 0) + tile_idx * tile_b
    row_dead = jnp.logical_or(tgt == ignore_index, grow >= batch)

    extra = jnp.where(tgt == ignore_col, jnp.float32(s_log_s),
                      smoothing_value * ign_val)
    row_loss = const_term - smoothing_value * s_row + t_coef * t_val + extra
    row_loss = jnp.where(row_dead, jnp.float32(0.0), row_loss)

    # Layout-preserving fold of 8-row groups onto the resident (8, 1) f32 block
    # (pure vreg adds; the scalar reduce happens once in the wrapper).
    psum_ref[...] += jnp.sum(row_loss.reshape(tile_b // 8, 8, 1), axis=0)


def label_smoothing_loss(output, target, *, label_smoothing, tgt_vocab_size,
                         ignore_index=-100, tile_b=None, num_slices=1):
    """output: (B, V) log-probs (any float dtype; feed bf16 on mem-bound parts);
    target: (B,) int. Returns scalar f32 (sum-reduced KL)."""
    assert 0.0 < label_smoothing <= 1.0
    assert tgt_vocab_size > 2
    B, V = output.shape
    assert V == tgt_vocab_size

    smoothing_value = label_smoothing / (tgt_vocab_size - 2)
    confidence = 1.0 - label_smoothing
    ignore_col = ignore_index % tgt_vocab_size        # Python-style negative indexing
    s_log_s = smoothing_value * math.log(smoothing_value)
    c_log_c = confidence * math.log(confidence) if confidence > 0.0 else 0.0
    const_term = (tgt_vocab_size - 2) * s_log_s + c_log_c
    t_coef = smoothing_value - confidence             # == smoothing_value when confidence == 0

    itemsize = jnp.dtype(output.dtype).itemsize
    row_mult = 8 * max(1, 4 // itemsize)              # packed-sublane multiple: 8 f32 / 16 bf16 / 32 i8

    # VMEM-aware sizing: 3/4 of physical VMEM as the scoped limit (v5e/v6e: 96 MiB,
    # v7x: 48 MiB), per-tile budget = (limit - fixed) / 8 to cover the double-buffered
    # input plus iota/select temps with headroom.
    try:
        vmem_cap = int(pltpu.get_tpu_info().vmem_capacity_bytes)
    except Exception:
        vmem_cap = 64 * 1024 * 1024                   # conservative (v7x per-core)
    vmem_limit = int(min(vmem_cap * 3 // 4, 96 * 1024 * 1024))

    sel_bytes = V * 128 * itemsize
    cap = pl.cdiv(B, row_mult) * row_mult             # never larger than one (padded) batch
    if tile_b is None:
        budget = max(512 * 1024, (vmem_limit - 2 * sel_bytes - 2 * 1024 * 1024) // 8)
        tile_b = budget // (V * itemsize)
        tile_b = min(tile_b, cap, 2048)
        tile_b = max(row_mult, (tile_b // row_mult) * row_mult)
        if num_slices > 1:
            # Balance the split so each core slice gets the same number of tiles.
            n_t = pl.cdiv(pl.cdiv(B, tile_b), num_slices) * num_slices
            tile_b = max(row_mult, pl.cdiv(pl.cdiv(B, n_t), row_mult) * row_mult)
    else:
        tile_b = min(tile_b, cap)
        tile_b = max(row_mult, (tile_b // row_mult) * row_mult)

    num_row_tiles = pl.cdiv(B, tile_b)
    tiles_per_slice = pl.cdiv(num_row_tiles, num_slices)
    last_tile = num_row_tiles - 1

    target_2d = target.astype(jnp.int32).reshape(B, 1)

    # Constant MXU helper: lane 0 = ones (row sum), lane 1 = onehot(ignore_col).
    # Exact in bf16; loaded into VMEM once (constant index_map).
    sel = jnp.zeros((V, 128), dtype=output.dtype)
    sel = sel.at[:, 0].set(jnp.ones((V,), dtype=output.dtype))
    sel = sel.at[ignore_col, 1].set(1)

    def row_block(c, j):
        # Clamp so the trailing slice never indexes past the last row tile; a
        # duplicated tile is fully masked in-kernel via `grow >= batch`.
        return (jnp.minimum(c * tiles_per_slice + j, last_tile), 0)

    kernel = functools.partial(
        _label_smoothing_kl_kernel,
        smoothing_value=smoothing_value, t_coef=t_coef,
        s_log_s=s_log_s, const_term=const_term,
        ignore_index=ignore_index, ignore_col=ignore_col,
        tiles_per_slice=tiles_per_slice, batch=B)

    cost = pl.CostEstimate(
        flops=int(2 * B * V * 128 + 6 * B * V),       # MXU rowsum dot + pick/mask VPU work
        transcendentals=0,
        bytes_accessed=int(B * V * itemsize + B * 4 + sel_bytes + num_slices * 8 * 4))

    partials = pl.pallas_call(
        kernel,
        out_shape=jax.ShapeDtypeStruct((num_slices * 8, 1), jnp.float32),
        grid=(num_slices, tiles_per_slice),
        in_specs=[
            pl.BlockSpec((tile_b, V), row_block),      # log-probs, native dtype (lane-dense V)
            pl.BlockSpec((tile_b, 1), row_block),      # targets
            pl.BlockSpec((V, 128), lambda c, j: (0, 0)),  # constant ones/onehot matrix
        ],
        out_specs=pl.BlockSpec((8, 1), lambda c, j: (c, 0)),
        compiler_params=pltpu.CompilerParams(
            dimension_semantics=("parallel", "arbitrary"),
            vmem_limit_bytes=vmem_limit),
        cost_estimate=cost,
    )(output, target_2d, sel)

    # Single tiny reduction of the per-slice partial sums.
    return jnp.sum(partials)


def _reference(output, target, *, label_smoothing, tgt_vocab_size, ignore_index):
    """Pure-JAX reference mirroring the PyTorch forward."""
    B, V = output.shape
    smoothing_value = label_smoothing / (tgt_vocab_size - 2)
    confidence = 1.0 - label_smoothing
    ignore_col = ignore_index % tgt_vocab_size
    col = jnp.arange(V)[None, :]
    tgt = target[:, None]
    p = jnp.where(col == ignore_col, 0.0, smoothing_value)
    p = jnp.where(col == tgt, confidence, p)
    p = jnp.where(tgt == ignore_index, 0.0, p)
    elem = jnp.where(p > 0, p * (jnp.log(jnp.where(p > 0, p, 1.0)) - output), 0.0)
    return jnp.sum(elem)


if __name__ == "__main__":
    V = 384                        # tgt_vocab_size (lane-dense, multiple of 128)
    LABEL_SMOOTHING = 0.1
    IGNORE_INDEX = -100            # PyTorch default; one_hot zero column = 284
    IGNORE_COL = IGNORE_INDEX % V

    key = jax.random.PRNGKey(0)
    k1, k2, k3, k4 = jax.random.split(key, 4)

    # --- small f32 case: single tile, exercises tail-row masking (B % 8 != 0) ---
    B = 20
    logits = jax.random.normal(k1, (B, V), dtype=jnp.float32)
    log_probs = jax.nn.log_softmax(logits, axis=-1)
    target = jax.random.randint(k2, (B,), 0, V, dtype=jnp.int32)
    target = target.at[3].set(IGNORE_INDEX)            # ignored row (masked_fill path)
    target = target.at[5].set(IGNORE_COL)              # target on ignore column (scatter wins)

    loss = jax.block_until_ready(label_smoothing_loss(
        log_probs, target, label_smoothing=LABEL_SMOOTHING,
        tgt_vocab_size=V, ignore_index=IGNORE_INDEX))
    ref = _reference(log_probs, target, label_smoothing=LABEL_SMOOTHING,
                     tgt_vocab_size=V, ignore_index=IGNORE_INDEX)
    assert jnp.allclose(loss, ref, rtol=1e-3, atol=1e-3), (loss, ref)

    # bf16 input path: streamed natively (half the HBM traffic), MXU accumulates in f32.
    lp_bf16 = log_probs.astype(jnp.bfloat16)
    loss_bf16 = jax.block_until_ready(label_smoothing_loss(
        lp_bf16, target, label_smoothing=LABEL_SMOOTHING,
        tgt_vocab_size=V, ignore_index=IGNORE_INDEX))
    ref_bf16 = _reference(lp_bf16.astype(jnp.float32), target,
                          label_smoothing=LABEL_SMOOTHING,
                          tgt_vocab_size=V, ignore_index=IGNORE_INDEX)
    assert jnp.allclose(loss_bf16, ref_bf16, rtol=1e-3, atol=1e-2), (loss_bf16, ref_bf16)

    # --- multi-tile / two-slice case: exercises pipelining, the clamped duplicate
    #     trailing tile and its row-level masking (num_row_tiles=5, num_slices=2) ---
    B2 = 300
    logits2 = jax.random.normal(k3, (B2, V), dtype=jnp.float32)
    lp2 = jax.nn.log_softmax(logits2, axis=-1)
    tgt2 = jax.random.randint(k4, (B2,), 0, V, dtype=jnp.int32)
    tgt2 = tgt2.at[0].set(IGNORE_INDEX)
    tgt2 = tgt2.at[77].set(IGNORE_INDEX)
    tgt2 = tgt2.at[131].set(IGNORE_COL)

    loss2 = jax.block_until_ready(label_smoothing_loss(
        lp2, tgt2, label_smoothing=LABEL_SMOOTHING,
        tgt_vocab_size=V, ignore_index=IGNORE_INDEX,
        tile_b=64, num_slices=2))
    ref2 = _reference(lp2, tgt2, label_smoothing=LABEL_SMOOTHING,
                      tgt_vocab_size=V, ignore_index=IGNORE_INDEX)
    assert jnp.allclose(loss2, ref2, rtol=1e-3, atol=1e-2), (loss2, ref2)

    print("KERNEL_OK")
</pallas_src>

<mosaic_0001>
module attributes {stable_mosaic.version = 11 : i64} {
  func.func @_label_smoothing_kl_kernel(%arg0: i32, %arg1: i32, %arg2: memref<24x384xf32, #tpu.memory_space<vmem>>, %arg3: memref<24x1xi32, #tpu.memory_space<vmem>>, %arg4: memref<384x128xf32, #tpu.memory_space<vmem>>, %arg5: memref<8x1xf32, #tpu.memory_space<vmem>>) attributes {dimension_semantics = [#tpu.dimension_semantics<parallel>, #tpu.dimension_semantics<arbitrary>], iteration_bounds = array<i64: 1, 1>, scalar_prefetch = 0 : i64, scratch_operands = 0 : i64, tpu.core_type = #tpu.core_type<tc>, window_params = [{transform_indices = @transform_0, window_bounds = array<i64: 24, 384>}, {transform_indices = @transform_1, window_bounds = array<i64: 24, 1>}, {pipeline_mode = #tpu.pipeline_mode<synchronous>, transform_indices = @transform_2, window_bounds = array<i64: 384, 128>}, {transform_indices = @transform_3, window_bounds = array<i64: 8, 1>}]} {
    %c0_i32 = arith.constant 0 : i32
    %0 = arith.cmpi eq, %arg1, %c0_i32 : i32
    %1 = arith.extui %0 : i1 to i32
    %c0_i32_0 = arith.constant 0 : i32
    %2 = arith.cmpi ne, %1, %c0_i32_0 : i32
    scf.if %2 {
      %cst_19 = arith.constant 0.000000e+00 : f32
      %48 = vector.broadcast %cst_19 : f32 to vector<8x1xf32>
      %c0_20 = arith.constant 0 : index
      %c0_21 = arith.constant 0 : index
      %49 = vector.load %arg5[%c0_20, %c0_21] : memref<8x1xf32, #tpu.memory_space<vmem>>, vector<8x1xf32>
      tpu.vector_store %arg5[%c0_20, %c0_21], %48 {strides = array<i32>} : memref<8x1xf32, #tpu.memory_space<vmem>>, vector<8x1xf32>,
    } else {
    }
    %c0 = arith.constant 0 : index
    %c0_1 = arith.constant 0 : index
    %3 = vector.load %arg2[%c0, %c0_1] : memref<24x384xf32, #tpu.memory_space<vmem>>, vector<24x384xf32>
    %c0_2 = arith.constant 0 : index
    %c0_3 = arith.constant 0 : index
    %4 = vector.load %arg3[%c0_2, %c0_3] : memref<24x1xi32, #tpu.memory_space<vmem>>, vector<24x1xi32>
    %c0_4 = arith.constant 0 : index
    %c0_5 = arith.constant 0 : index
    %5 = vector.load %arg4[%c0_4, %c0_5] : memref<384x128xf32, #tpu.memory_space<vmem>>, vector<384x128xf32>
    %cst = arith.constant dense<0.000000e+00> : vector<24x128xf32>
    %6 = tpu.matmul %3, %5, %cst {dimension_numbers = #tpu.dot_dimension_numbers<[1], [0], [0], [1], [0, 0, 1, 1], [], []>} : vector<24x384xf32>, vector<384x128xf32>, vector<24x128xf32> -> vector<24x128xf32>
    %7 = vector.extract_strided_slice %6 {offsets = [0, 0], sizes = [24, 1], strides = [1, 1]} : vector<24x128xf32> to vector<24x1xf32>
    %8 = vector.extract_strided_slice %6 {offsets = [0, 1], sizes = [24, 1], strides = [1, 1]} : vector<24x128xf32> to vector<24x1xf32>
    %9 = tpu.iota {dimensions = array<i32: 1>} : vector<24x384xi32>
    %10 = vector.broadcast %4 : vector<24x1xi32> to vector<24x384xi32>
    %11 = arith.cmpi eq, %9, %10 : vector<24x384xi32>
    %cst_6 = arith.constant 0.000000e+00 : f32
    %12 = vector.broadcast %cst_6 : f32 to vector<24x384xf32>
    %13 = arith.select %11, %3, %12 : vector<24x384xi1>, vector<24x384xf32>
    %cst_7 = arith.constant dense<0.000000e+00> : vector<24xf32>
    %14 = vector.multi_reduction <add>, %13, %cst_7 [1] : vector<24x384xf32> to vector<24xf32>
    %15 = vector.shape_cast %14 : vector<24xf32> to vector<24x1xf32>
    %c1_i32 = arith.constant 1 : i32
    %16 = arith.muli %arg0, %c1_i32 : i32
    %17 = arith.addi %16, %arg1 : i32
    %18 = tpu.iota {dimensions = array<i32: 0>} : vector<24x1xi32>
    %c24_i32 = arith.constant 24 : i32
    %19 = arith.muli %17, %c24_i32 : i32
    %20 = vector.broadcast %19 : i32 to vector<24x1xi32>
    %21 = arith.addi %18, %20 : vector<24x1xi32>
    %c-100_i32 = arith.constant -100 : i32
    %22 = vector.broadcast %c-100_i32 : i32 to vector<24x1xi32>
    %23 = arith.cmpi eq, %4, %22 : vector<24x1xi32>
    %c20_i32 = arith.constant 20 : i32
    %24 = vector.broadcast %c20_i32 : i32 to vector<24x1xi32>
    %25 = arith.cmpi sge, %21, %24 : vector<24x1xi32>
    %26 = arith.ori %23, %25 : vector<24x1xi1>
    %c284_i32 = arith.constant 284 : i32
    %27 = vector.broadcast %c284_i32 : i32 to vector<24x1xi32>
    %28 = arith.cmpi eq, %4, %27 : vector<24x1xi32>
    %cst_8 = arith.constant 2.61780107E-4 : f32
    %29 = vector.broadcast %cst_8 : f32 to vector<24x1xf32>
    %30 = arith.mulf %29, %8 : vector<24x1xf32>
    %cst_9 = arith.constant -0.00215916382 : f32
    %31 = vector.broadcast %cst_9 : f32 to vector<24x1xf32>
    %32 = arith.select %28, %31, %30 : vector<24x1xi1>, vector<24x1xf32>
    %cst_10 = arith.constant 2.61780107E-4 : f32
    %33 = vector.broadcast %cst_10 : f32 to vector<24x1xf32>
    %34 = arith.mulf %33, %7 : vector<24x1xf32>
    %cst_11 = arith.constant -0.919625044 : f32
    %35 = vector.broadcast %cst_11 : f32 to vector<24x1xf32>
    %36 = arith.subf %35, %34 : vector<24x1xf32>
    %cst_12 = arith.constant -0.899738192 : f32
    %37 = vector.broadcast %cst_12 : f32 to vector<24x1xf32>
    %38 = arith.mulf %37, %15 : vector<24x1xf32>
    %39 = arith.addf %36, %38 : vector<24x1xf32>
    %40 = arith.addf %39, %32 : vector<24x1xf32>
    %cst_13 = arith.constant 0.000000e+00 : f32
    %41 = vector.broadcast %cst_13 : f32 to vector<24x1xf32>
    %42 = arith.select %26, %41, %40 : vector<24x1xi1>, vector<24x1xf32>
    %c0_14 = arith.constant 0 : index
    %c0_15 = arith.constant 0 : index
    %43 = vector.load %arg5[%c0_14, %c0_15] : memref<8x1xf32, #tpu.memory_space<vmem>>, vector<8x1xf32>
    %44 = vector.shape_cast %42 : vector<24x1xf32> to vector<3x8x1xf32>
    %cst_16 = arith.constant dense<0.000000e+00> : vector<8x1xf32>
    %45 = vector.multi_reduction <add>, %44, %cst_16 [0] : vector<3x8x1xf32> to vector<8x1xf32>
    %46 = arith.addf %43, %45 : vector<8x1xf32>
    %c0_17 = arith.constant 0 : index
    %c0_18 = arith.constant 0 : index
    %47 = vector.load %arg5[%c0_17, %c0_18] : memref<8x1xf32, #tpu.memory_space<vmem>>, vector<8x1xf32>
    tpu.vector_store %arg5[%c0_17, %c0_18], %46 {strides = array<i32>} : memref<8x1xf32, #tpu.memory_space<vmem>>, vector<8x1xf32>,
    return
  }
  func.func @transform_0(%arg0: i32, %arg1: i32) -> (i32, i32) {
    %c1_i32 = arith.constant 1 : i32
    %0 = arith.muli %arg0, %c1_i32 : i32
    %1 = arith.addi %0, %arg1 : i32
    %c0_i32 = arith.constant 0 : i32
    %2 = arith.minsi %1, %c0_i32 : i32
    %c0_i32_0 = arith.constant 0 : i32
    %c0_i32_1 = arith.constant 0 : i32
    return %2, %c0_i32_0 : i32, i32
  }
  func.func @transform_1(%arg0: i32, %arg1: i32) -> (i32, i32) {
    %c1_i32 = arith.constant 1 : i32
    %0 = arith.muli %arg0, %c1_i32 : i32
    %1 = arith.addi %0, %arg1 : i32
    %c0_i32 = arith.constant 0 : i32
    %2 = arith.minsi %1, %c0_i32 : i32
    %c0_i32_0 = arith.constant 0 : i32
    %c0_i32_1 = arith.constant 0 : i32
    return %2, %c0_i32_0 : i32, i32
  }
  func.func @transform_2(%arg0: i32, %arg1: i32) -> (i32, i32) {
    %c0_i32 = arith.constant 0 : i32
    %c0_i32_0 = arith.constant 0 : i32
    %c0_i32_1 = arith.constant 0 : i32
    return %c0_i32, %c0_i32_0 : i32, i32
  }
  func.func @transform_3(%arg0: i32, %arg1: i32) -> (i32, i32) {
    %c0_i32 = arith.constant 0 : i32
    %c0_i32_0 = arith.constant 0 : i32
    return %arg0, %c0_i32 : i32, i32
  }
}

</mosaic_0001>

<bundles_post_ra>
// kernel: tpu_custom_call.1
= control target key start
LH: loop header
LB: loop body
LE: loop exit
PB: predicated region body
PF: predicated region fallthrough
CT: control target
= control target key end

     0   :  { %8 = vsyncpa [#allocation3], 0  ;;  %s764_s0 = inlined_call_operand.hbm [shape: f32[20,384], index: 0, kind: input, shape index: {}]   ;;  %s765_s1 = inlined_call_operand.vmem [shape: s32[20,1], index: 1, kind: input, shape index: {}]   ;;  %s766_s2 = inlined_call_operand.hbm [shape: f32[384,128], index: 2, kind: input, shape index: {}]   ;;  %s767_s3 = inlined_call_operand.vmem [shape: f32[8,1], index: 3, kind: output, shape index: {}]  }
   0x1   :  { %9 = vsyncpa [#allocation5], 0  ;;  %s650_s12 = smov [#allocation2]   ;;  %s602_s16 = scalar_lea.hbm %s764_s0, 1152 }
   0x2   :  { %s22_s13 = sshll.u32 %s650_s12, 4  ;;  %p603_p0 = scmp.ne.s32.totalorder %s764_s0, %s602_s16  ;;  %s23_s13 = int_to_ptr.vmem [resolvable:$true] %s22_s13 }
   0x3   :  { %p606_p1 = scmp.lt.u32.totalorder %s602_s16, %s764_s0 }
   0x5   :  { %p608_p2 = pnand %p606_p1, %p603_p0 }
   0x7   :  { %611 = shalt.err (!%p608_p2)
}
   0x8   :  { %s612_s21 = scalar_lea.vmem %s23_s13, 1152  ;;  %p617_p4 = scmp.lt.s32.totalorder %s23_s13, %s23_s13 }
   0x9   :  { %p613_p3 = scmp.ne.s32.totalorder %s23_s13, %s612_s21  ;;  %p618_p5 = scmp.lt.s32.totalorder %s612_s21, %s612_s21 }
   0xb   :  { %p619_p6 = por %p618_p5, %p617_p4 }
   0xd   :  { %p620_p7 = pnand %p619_p6, %p613_p3 }
   0xf   :  { %623 = shalt.err (!%p620_p7)
}
  0x10   :  { %s651_s22 = smov 384   ;;  %s652_s23 = smov 24  }
  0x11   :  { %28 = dma.hbm_to_vmem [thread:$0]  %s764_s0, 1152, %s23_s13, [#allocation3], %s651_s22, %s651_s22, %s652_s23  }
  0x12   :  { %s653_s26 = smov [#allocation4]   ;;  %s624_s30 = scalar_lea.hbm %s766_s2, 6144 }
  0x13   :  { %s48_s27 = sshll.u32 %s653_s26, 4  ;;  %p625_p8 = scmp.ne.s32.totalorder %s766_s2, %s624_s30  ;;  %s49_s27 = int_to_ptr.vmem [resolvable:$true] %s48_s27 }
  0x14   :  { %p628_p9 = scmp.lt.u32.totalorder %s624_s30, %s766_s2 }
  0x16   :  { %p630_p10 = pnand %p628_p9, %p625_p8 }
  0x18   :  { %633 = shalt.err (!%p630_p10)
}
  0x19   :  { %s634_s8 = scalar_lea.vmem %s49_s27, 6144  ;;  %p639_p12 = scmp.lt.s32.totalorder %s49_s27, %s49_s27 }
  0x1a   :  { %p635_p11 = scmp.ne.s32.totalorder %s49_s27, %s634_s8  ;;  %p640_p13 = scmp.lt.s32.totalorder %s634_s8, %s634_s8 }
  0x1c   :  { %p641_p0 = por %p640_p13, %p639_p12 }
  0x1e   :  { %p642_p1 = pnand %p641_p0, %p635_p11 }
  0x20   :  { %645 = shalt.err (!%p642_p1)
}
  0x21   :  { %s654_s0 = smov 128   ;;  %s655_s9 = smov 8  }
  0x22   :  { %54 = dma.hbm_to_vmem [thread:$0]  %s766_s2, 6144, %s49_s27, [#allocation5], %s654_s0, %s654_s0, %s655_s9  }
  0x23   :  { %646 = dma.done.wait [#allocation3], 1152  }
  0x24   :  { %647 = vsyncadd [#allocation3], 4294966144 }
  0x25   :  { %648 = dma.done.wait [#allocation5], 6144  }
  0x26   :  { %649 = vsyncadd [#allocation5], 4294961152  ;;  %vm89_vm0 = vcmask 7168   ;;  %v656_v0 = vmov 0   ;;  %v657_v1 = vmov 0.0|0.0   ;;  %v658_v2 = vmov 0.0  }
  0x27   :  { %600 = vset.pattern.permute.xlu0 %v656_v0  ;;  %565 = vmatprep.subr.bf16.mxu1 %v657_v1  ;;  %90 = vst.msk [vmem:[%s767_s3] sm:$0xff] %vm89_vm0, %v658_v2  ;;  %vm659_vm1 = vmmov 0   ;;  %v716_v3 = vld [vmem:[%s765_s1] sm:$0xff]  ;;  %v119_v4 = vld [vmem:[#allocation4 + $0x80] sm:$0xff]  ;;  %v120_v5 = vld [vmem:[#allocation4 + $0x88] sm:$0xff] }
  0x28   :  { %601 = vset.pattern.permute.xlu1 %v656_v0  ;;  %524 = vmatprep.mubr.msk.f32.mxu1 %vm659_vm1, %v658_v2  ;;  %v533_v6 = vpack.c.bf16 %v120_v5, %v119_v4  ;;  %v103_v7 = vld [vmem:[#allocation4] sm:$0xff]  ;;  %v104_v8 = vld [vmem:[#allocation4 + $0x8] sm:$0xff]  ;;  %v121_v13 = vld [vmem:[#allocation4 + $0x90] sm:$0xff]  ;;  %vm373_vm11 = vcmp.eq.s32.totalorder %v716_v3, 284  ;;  %vm364_vm13 = vcmp.eq.s32.totalorder %v716_v3, 4294967196 }
  0x29   :  { %316 = vperm.xlu0 %600, %v716_v3   ;;  %v722_v9 = vld [vmem:[%s765_s1 + $0x8] sm:$0xff]  ;;  %v535_v10 = vpack.c.bf16 %v104_v8, %v103_v7  ;;  %v136_v12 = vld [vmem:[#allocation4 + $0x108] sm:$0xff]  ;;  %v122_v15 = vld [vmem:[#allocation4 + $0x98] sm:$0xff] }
  0x2a   :  { %v135_v11 = vld [vmem:[#allocation4 + $0x100] sm:$0xff]  ;;  %534 = vmatprep.subr.bf16.mxu0 %v533_v6  ;;  %v105_v16 = vld [vmem:[#allocation4 + $0x10] sm:$0xff]  ;;  %v106_v17 = vld [vmem:[#allocation4 + $0x18] sm:$0xff]  ;;  %v537_v18 = vpack.c.bf16 %v122_v15, %v121_v13  ;;  %vm374_vm12 = vcmp.eq.s32.totalorder %v722_v9, 284  ;;  %vm365_vm14 = vcmp.eq.s32.totalorder %v722_v9, 4294967196 }
  0x2b   :  { %v566_v14 = vpack.c.bf16 %v136_v12, %v135_v11  ;;  %536 = vmatpush3.bf16.msra.mxu0 %v535_v10  ;;  %v539_v19 = vpack.c.bf16 %v106_v17, %v105_v16  ;;  %v727_v20 = vld [vmem:[%s765_s1 + $0x10] sm:$0xff]  ;;  %v137_v21 = vld [vmem:[#allocation4 + $0x110] sm:$0xff]  ;;  %v138_v22 = vld [vmem:[#allocation4 + $0x118] sm:$0xff]  ;;  %s660_s1 = smov 127  }
  0x2c   :  { %v569_v23 = vpack.c.bf16 %v138_v22, %v137_v21  ;;  %v123_v24 = vld [vmem:[#allocation4 + $0xa0] sm:$0xff]  ;;  %v124_v25 = vld [vmem:[#allocation4 + $0xa8] sm:$0xff]  ;;  %538 = vmatprep.subr.bf16.mxu0 %v537_v18  ;;  %322 = vperm.xlu1 %601, %v727_v20   ;;  %v125_v31 = vld [vmem:[#allocation4 + $0xb0] sm:$0xff]  ;;  %vm366_vm15 = vcmp.eq.s32.totalorder %v727_v20, 4294967196 }
  0x2d   :  { %319 = vperm.xlu0 %600, %v722_v9   ;;  %567 = vmatpush3.bf16.msra.mxu1 %v566_v14  ;;  %v107_v26 = vld [vmem:[#allocation4 + $0x20] sm:$0xff]  ;;  %v541_v27 = vpack.c.bf16 %v124_v25, %v123_v24  ;;  %v108_v28 = vld [vmem:[#allocation4 + $0x28] sm:$0xff]  ;;  %v126_v32 = vld [vmem:[#allocation4 + $0xb8] sm:$0xff] }
  0x2e   :  { %568 = vmatprep.subr.bf16.mxu1 %v657_v1  ;;  %v139_v29 = vld [vmem:[#allocation4 + $0x120] sm:$0xff]  ;;  %v140_v30 = vld [vmem:[#allocation4 + $0x128] sm:$0xff]  ;;  %v543_v33 = vpack.c.bf16 %v108_v28, %v107_v26  ;;  %v545_v35 = vpack.c.bf16 %v126_v32, %v125_v31  ;;  %v109_v36 = vld [vmem:[#allocation4 + $0x30] sm:$0xff] }
  0x2f   :  { %540 = vmatpush3.bf16.msra.mxu0 %v539_v19  ;;  %v572_v34 = vpack.c.bf16 %v140_v30, %v139_v29  ;;  %v110_v37 = vld [vmem:[#allocation4 + $0x38] sm:$0xff]  ;;  %v141_v38 = vld [vmem:[#allocation4 + $0x130] sm:$0xff]  ;;  %v127_v40 = vld [vmem:[#allocation4 + $0xc0] sm:$0xff] }
  0x30   :  { %542 = vmatprep.subr.bf16.mxu0 %v541_v27  ;;  %v142_v39 = vld [vmem:[#allocation4 + $0x138] sm:$0xff]  ;;  %v128_v41 = vld [vmem:[#allocation4 + $0xc8] sm:$0xff]  ;;  %v547_v42 = vpack.c.bf16 %v110_v37, %v109_v36  ;;  %v111_v45 = vld [vmem:[#allocation4 + $0x40] sm:$0xff]  ;;  %v311_v27 = vlaneseq }
  0x31   :  { %570 = vmatpush3.bf16.msra.mxu1 %v569_v23  ;;  %v575_v43 = vpack.c.bf16 %v142_v39, %v141_v38  ;;  %v549_v44 = vpack.c.bf16 %v128_v41, %v127_v40  ;;  %v112_v46 = vld [vmem:[#allocation4 + $0x48] sm:$0xff]  ;;  %v143_v47 = vld [vmem:[#allocation4 + $0x140] sm:$0xff]  ;;  %v129_v49 = vld [vmem:[#allocation4 + $0xd0] sm:$0xff] }
  0x32   :  { %571 = vmatprep.subr.bf16.mxu1 %v657_v1  ;;  %v144_v48 = vld [vmem:[#allocation4 + $0x148] sm:$0xff]  ;;  %v130_v50 = vld [vmem:[#allocation4 + $0xd8] sm:$0xff]  ;;  %v551_v51 = vpack.c.bf16 %v112_v46, %v111_v45  ;;  %v734_v52 = vld [vmem:[#allocation2 + $0x8] sm:$0xff]  ;;  %v312_v28 = vand.u32 127, %v311_v27 }
  0x33   :  { %544 = vmatpush3.bf16.msra.mxu0 %v543_v33  ;;  %v578_v53 = vpack.c.bf16 %v144_v48, %v143_v47  ;;  %v553_v54 = vpack.c.bf16 %v130_v50, %v129_v49  ;;  %v113_v55 = vld [vmem:[#allocation4 + $0x50] sm:$0xff]  ;;  %v114_v56 = vld [vmem:[#allocation4 + $0x58] sm:$0xff]  ;;  %v131_v59 = vld [vmem:[#allocation4 + $0xe0] sm:$0xff]  ;;  %215 = vmatprep.mubr.f32.mxu0 %v734_v52 }
  0x34   :  { %546 = vmatprep.subr.bf16.mxu0 %v545_v35  ;;  %v145_v57 = vld [vmem:[#allocation4 + $0x150] sm:$0xff]  ;;  %v146_v58 = vld [vmem:[#allocation4 + $0x158] sm:$0xff]  ;;  %v132_v60 = vld [vmem:[#allocation4 + $0xe8] sm:$0xff]  ;;  %v555_v61 = vpack.c.bf16 %v114_v56, %v113_v55  ;;  %v313_v29 = vadd.s32 128, %v312_v28  ;;  %v314_v30 = vadd.s32 256, %v312_v28 }
  0x35   :  { %573 = vmatpush3.bf16.msra.mxu1 %v572_v34  ;;  %v581_v62 = vpack.c.bf16 %v146_v58, %v145_v57  ;;  %v557_v63 = vpack.c.bf16 %v132_v60, %v131_v59  ;;  %v115_v0 = vld [vmem:[#allocation4 + $0x60] sm:$0xff]  ;;  %v116_v4 = vld [vmem:[#allocation4 + $0x68] sm:$0xff]  ;;  %v133_v7 = vld [vmem:[#allocation4 + $0xf0] sm:$0xff] }
  0x36   :  { %574 = vmatprep.subr.bf16.mxu1 %v657_v1  ;;  %v147_v5 = vld [vmem:[#allocation4 + $0x160] sm:$0xff]  ;;  %v148_v6 = vld [vmem:[#allocation4 + $0x168] sm:$0xff]  ;;  %v134_v8 = vld [vmem:[#allocation4 + $0xf8] sm:$0xff]  ;;  %v559_v10 = vpack.c.bf16 %v116_v4, %v115_v0 }
  0x37   :  { %548 = vmatpush3.bf16.msra.mxu0 %v547_v42  ;;  %v584_v11 = vpack.c.bf16 %v148_v6, %v147_v5  ;;  %v561_v12 = vpack.c.bf16 %v134_v8, %v133_v7  ;;  %v117_v13 = vld [vmem:[#allocation4 + $0x70] sm:$0xff]  ;;  %v118_v14 = vld [vmem:[#allocation4 + $0x78] sm:$0xff]  ;;  %v93_v21 = vld [vmem:[#allocation2 + $0x10] sm:$0xff] }
  0x38   :  { %550 = vmatprep.subr.bf16.mxu0 %v549_v44  ;;  %v149_v15 = vld [vmem:[#allocation4 + $0x170] sm:$0xff]  ;;  %v150_v16 = vld [vmem:[#allocation4 + $0x178] sm:$0xff]  ;;  %v563_v17 = vpack.c.bf16 %v118_v14, %v117_v13  ;;  %v96_v24 = vld [vmem:[#allocation2 + $0x28] sm:$0xff]  ;;  %v356_v13 = vshrl.u32 %v311_v27, 7 }
  0x39   :  { %576 = vmatpush3.bf16.msra.mxu1 %v575_v43  ;;  %v587_v18 = vpack.c.bf16 %v150_v16, %v149_v15  ;;  %v91_v19 = vld [vmem:[#allocation2] sm:$0xff]  ;;  %v94_v23 = vld [vmem:[#allocation2 + $0x18] sm:$0xff]  ;;  %v97_v26 = vld [vmem:[#allocation2 + $0x30] sm:$0xff] }
  0x3a   :  { %577 = vmatprep.subr.bf16.mxu1 %v657_v1  ;;  %v95_v22 = vld [vmem:[#allocation2 + $0x20] sm:$0xff]  ;;  %v98_v25 = vld [vmem:[#allocation2 + $0x38] sm:$0xff] }
  0x3b   :  { %552 = vmatpush3.bf16.msra.mxu0 %v551_v51 }
  0x3c   :  { %554 = vmatprep.subr.bf16.mxu0 %v553_v54 }
  0x3d   :  { %579 = vmatpush3.bf16.msra.mxu1 %v578_v53 }
  0x3e   :  { %580 = vmatprep.subr.bf16.mxu1 %v657_v1 }
  0x3f   :  { %556 = vmatpush3.bf16.msra.mxu0 %v555_v61 }
  0x40   :  { %558 = vmatprep.subr.bf16.mxu0 %v557_v63 }
  0x41   :  { %582 = vmatpush3.bf16.msra.mxu1 %v581_v62 }
  0x42   :  { %583 = vmatprep.subr.bf16.mxu1 %v657_v1 }
  0x43   :  { %560 = vmatpush3.bf16.msra.mxu0 %v559_v10 }
  0x44   :  { %562 = vmatprep.subr.bf16.mxu0 %v561_v12 }
  0x45   :  { %585 = vmatpush3.bf16.msra.mxu1 %v584_v11 }
  0x46   :  { %586 = vmatprep.subr.bf16.mxu1 %v657_v1  ;;  %v99_v1 = vld [vmem:[#allocation2 + $0x40] sm:$0xff] }
  0x47   :  { %564 = vmatpush3.bf16.msra.mxu0 %v563_v17 }
  0x49   :  { %588 = vmatpush3.bf16.msra.mxu1 %v587_v18 }
  0x4a   :  { %216 = vmatmul.mubr.f32.vlgmr.msra.gmra.mrb[0].mxu0 %v91_v19 }
  0x4b   :  { %220 = vmatprep.mubr.f32.mxu0 %v95_v22 }
  0x4c   :  { %525 = vmatmul.mubr.f32.vlgmr.msra.gmra.mrb[0].mxu1 %v93_v21 }
  0x4d   :  { %527 = vmatprep.mubr.msk.f32.mxu1 %vm659_vm1, %v658_v2 }
  0x4e   :  { %221 = vmatmul.mubr.f32.gmra.mrb[2].mxu0 %v94_v23 }
  0x4f   :  { %225 = vmatprep.mubr.f32.mxu0 %v98_v25 }
  0x50   :  { %528 = vmatmul.mubr.f32.gmra.mrb[2].mxu1 %v96_v24 }
  0x51   :  { %530 = vmatprep.mubr.msk.f32.mxu1 %vm659_vm1, %v658_v2  ;;  %vm375_vm1 = vcmp.eq.s32.totalorder %v727_v20, 284  ;;  %v409_v20 = vld [vmem:[%s767_s3] sm:$0xff] }
  0x52   :  { %226 = vmatmul.mubr.f32.gmra.mrb[4].mxu0 %v97_v26 }
  0x54   :  { %531 = vmatmul.mubr.f32.gmra.mrb[4].mxu1 %v99_v1 }
  0xa8   :  { %v317_v31 = vpop.permute.xlu0 %316 }
  0xa9   :  { %vm324_vm2 = vcmp.eq.s32.totalorder %v312_v28, %v317_v31  ;;  %vm325_vm3 = vcmp.eq.s32.totalorder %v313_v29, %v317_v31  ;;  %vm326_vm4 = vcmp.eq.s32.totalorder %v314_v30, %v317_v31 }
  0xaa   :  { %v333_v32 = vsel %vm324_vm2, %v91_v19, 0.0  ;;  %v334_v33 = vsel %vm325_vm3, %v734_v52, 0.0  ;;  %v335_v34 = vsel %vm326_vm4, %v93_v21, 0.0 }
  0xab   :  { %v342_v35 = vadd.f32 %v334_v33, %v333_v32  ;;  %v323_v37 = vpop.permute.xlu1 %322 }
  0xac   :  { %v320_v36 = vpop.permute.xlu0 %319  ;;  %vm330_vm8 = vcmp.eq.s32.totalorder %v312_v28, %v323_v37  ;;  %vm331_vm9 = vcmp.eq.s32.totalorder %v313_v29, %v323_v37  ;;  %vm332_vm10 = vcmp.eq.s32.totalorder %v314_v30, %v323_v37 }
  0xad   :  { %vm327_vm5 = vcmp.eq.s32.totalorder %v312_v28, %v320_v36  ;;  %vm328_vm6 = vcmp.eq.s32.totalorder %v313_v29, %v320_v36  ;;  %v343_v2 = vadd.f32 %v342_v35, %v335_v34  ;;  %vm329_vm7 = vcmp.eq.s32.totalorder %v314_v30, %v320_v36 }
  0xae   :  { %v336_v38 = vsel %vm327_vm5, %v94_v23, 0.0  ;;  %v337_v39 = vsel %vm328_vm6, %v95_v22, 0.0  ;;  %v338_v40 = vsel %vm329_vm7, %v96_v24, 0.0  ;;  %v339_v42 = vsel %vm330_vm8, %v97_v26, 0.0 }
  0xaf   :  { %344 = vadd.xlane.f32.xlu1 %v343_v2  ;;  %v346_v41 = vadd.f32 %v337_v39, %v336_v38  ;;  %v340_v43 = vsel %vm331_vm9, %v98_v25, 0.0  ;;  %v341_v44 = vsel %vm332_vm10, %v99_v1, 0.0  ;;  %v358_v22 = vadd.s32 16, %v356_v13 }
  0xb0   :  { %v350_v46 = vadd.f32 %v340_v43, %v339_v42 }
  0xb1   :  { %v347_v45 = vadd.f32 %v346_v41, %v338_v40  ;;  %vm369_vm2 = vcmp.ge.s32.totalorder %v358_v22, 20 }
  0xb2   :  { %v351_v47 = vadd.f32 %v350_v46, %v341_v44  ;;  %vm372_vm3 = vmor %vm366_vm15, %vm369_vm2 }
  0xb3   :  { %348 = vadd.xlane.f32.xlu0 %v347_v45 }
  0xb7   :  { %352 = vadd.xlane.f32.xlu0 %v351_v47 }
 0x11d   :  { %v464_v48 = vpop.f32.mrb[0].mxu0 }
 0x11e   :  { %v465_v49 = vpop.f32.mrb[1].mxu0 }
 0x11f   :  { %v297_v50 = vpop.f32.mrb[0].mxu1  ;;  %v466_v51 = vadd.f32 %v465_v49, %v464_v48 }
 0x120   :  { %v526_v52 = vpop.f32.mrb[1].mxu1 }
 0x121   :  { %v298_v53 = vadd.f32 %v466_v51, %v297_v50  ;;  %v467_v54 = vpop.f32.mrb[2].mxu0 }
 0x122   :  { %v468_v55 = vpop.f32.mrb[3].mxu0 }
 0x123   :  { %v302_v56 = vpop.f32.mrb[2].mxu1  ;;  %v376_v57 = vmul.f32 0.0002617801, %v298_v53  ;;  %v469_v58 = vadd.f32 %v468_v55, %v467_v54 }
 0x124   :  { %v529_v59 = vpop.f32.mrb[3].mxu1 }
 0x125   :  { %v303_v60 = vadd.f32 %v469_v58, %v302_v56  ;;  %v470_v61 = vpop.f32.mrb[4].mxu0  ;;  %382 = vrot.lane.b32.xlu1 %v376_v57, %s660_s1  ;;  %v394_v12 = vsub.f32 -0.91962504, %v376_v57 }
 0x126   :  { %v471_v62 = vpop.f32.mrb[5].mxu0 }
 0x127   :  { %v307_v63 = vpop.f32.mrb[4].mxu1  ;;  %v377_v0 = vmul.f32 0.0002617801, %v303_v60  ;;  %v472_v4 = vadd.f32 %v471_v62, %v470_v61 }
 0x128   :  { %v532_v5 = vpop.f32.mrb[5].mxu1 }
 0x129   :  { %v308_v6 = vadd.f32 %v472_v4, %v307_v63  ;;  %384 = vrot.lane.b32.xlu0 %v377_v0, %s660_s1  ;;  %v395_v19 = vsub.f32 -0.91962504, %v377_v0 }
 0x12b   :  { %v378_v7 = vmul.f32 0.0002617801, %v308_v6 }
 0x12d   :  { %386 = vrot.lane.b32.xlu1 %v378_v7, %s660_s1  ;;  %v396_v1 = vsub.f32 -0.91962504, %v378_v7 }
 0x13c   :  { %v345_v8 = vpop.xlane.xlu1 %344 }
 0x13d   :  { %v397_v11 = vmul.f32 -0.8997382, %v345_v8 }
 0x13f   :  { %v400_v14 = vadd.f32 %v397_v11, %v394_v12 }
 0x140   :  { %v349_v10 = vpop.xlane.xlu0 %348 }
 0x141   :  { %v398_v15 = vmul.f32 -0.8997382, %v349_v10 }
 0x143   :  { %v401_v23 = vadd.f32 %v398_v15, %v395_v19 }
 0x144   :  { %v353_v16 = vpop.xlane.xlu0 %352 }
 0x145   :  { %v399_v24 = vmul.f32 -0.8997382, %v353_v16 }
 0x147   :  { %v402_v29 = vadd.f32 %v399_v24, %v396_v1 }
 0x197   :  { %v383_v17 = vpop.permute.xlu1 %382 }
 0x198   :  { %v391_v18 = vsel %vm373_vm11, -0.0021591638, %v383_v17 }
 0x199   :  { %v403_v21 = vadd.f32 %v400_v14, %v391_v18 }
 0x19b   :  { %v385_v25 = vpop.permute.xlu0 %384  ;;  %v406_v27 = vsel %vm364_vm13, 0.0, %v403_v21 }
 0x19c   :  { %v392_v26 = vsel %vm374_vm12, -0.0021591638, %v385_v25  ;;  %v411_v32 = vsel %vm89_vm0, %v406_v27, 0.0 }
 0x19d   :  { %v404_v28 = vadd.f32 %v401_v23, %v392_v26 }
 0x19f   :  { %v407_v30 = vsel %vm365_vm14, 0.0, %v404_v28  ;;  %v387_v31 = vpop.permute.xlu1 %386 }
 0x1a0   :  { %v412_v3 = vsel %vm89_vm0, %v407_v30, 0.0  ;;  %v393_v33 = vsel %vm375_vm1, -0.0021591638, %v387_v31 }
 0x1a1   :  { %v413_v34 = vadd.f32 %v412_v3, %v411_v32  ;;  %v405_v9 = vadd.f32 %v402_v29, %v393_v33 }
 0x1a3   :  { %v408_v35 = vsel %vm372_vm3, 0.0, %v405_v9 }
 0x1a4   :  { %v414_v36 = vsel %vm89_vm0, %v408_v35, 0.0 }
 0x1a5   :  { %v415_v2 = vadd.f32 %v414_v36, %v413_v34 }
 0x1a7   :  { %v416_v37 = vadd.f32 %v415_v2, %v409_v20 }
 0x1a9   :  { %417 = vst.msk [vmem:[%s767_s3] sm:$0xff] %vm89_vm0, %v416_v37 }
 0x1aa   :  { %422 = vsyncpa [#allocation3], 1 }
 0x1ab   :  { %423 = vsyncpa [#allocation5], 1 }

</bundles_post_ra>
